<compile_context>
chip_gen: v7x
topology: tpu7x:2x2x1
jax: 0.10.0
libtpu: 0.0.40
codegen_flags: <defaults>
</compile_context>

<pallas_src>
import functools

import jax
import jax.numpy as jnp
from jax.experimental import pallas as pl
from jax.experimental.pallas import tpu as pltpu


def _attention_kernel(x_ref, wqkv_ref, wout_ref, bout_ref, o_ref,
                      qkv_ref, ctx_ref, *, bt, heads, dim_head):
    """One block of `bt` batch elements per grid step.

    x_ref    : (bt, N, dim)      f32  VMEM
    wqkv_ref : (dim, 3*inner)    bf16 VMEM (Q columns pre-scaled by dim_head**-0.5)
    wout_ref : (inner, dim)      bf16 VMEM
    bout_ref : (1, dim)          f32  VMEM
    o_ref    : (bt, N, dim)      f32  VMEM
    qkv_ref  : (bt, N, 3*inner)  bf16 VMEM scratch
    ctx_ref  : (bt, N, inner)    bf16 VMEM scratch (per-head outputs, no concat)
    """
    inner = heads * dim_head
    n = x_ref.shape[1]
    dim = x_ref.shape[2]

    # --- QKV projection over all bt*N rows at once (fills the MXU M dim).
    # bf16 operands, f32 accumulation; cast to bf16 at the scratch store so
    # no f32 copy of qkv stays resident. ---
    xb = x_ref[...].reshape(bt * n, dim).astype(jnp.bfloat16)
    qkv = jnp.dot(xb, wqkv_ref[...], preferred_element_type=jnp.float32)
    qkv_ref[...] = qkv.astype(jnp.bfloat16).reshape(bt, n, 3 * inner)

    # --- per-head scaled dot-product attention, batched over the bt batch
    # elements of this block. Static unroll is fine for small head counts. ---
    for h in range(heads):
        q = qkv_ref[:, :, h * dim_head:(h + 1) * dim_head]                      # (bt, N, dh)
        k = qkv_ref[:, :, inner + h * dim_head:inner + (h + 1) * dim_head]      # (bt, N, dh)
        v = qkv_ref[:, :, 2 * inner + h * dim_head:2 * inner + (h + 1) * dim_head]

        # q @ k^T with a leading batch dim; no transpose materialized.
        s = jnp.einsum('bqd,bkd->bqk', q, k,
                       preferred_element_type=jnp.float32)                      # (bt, N, N) f32

        # Numerically-stable softmax in f32 (VPU + EUP).
        s = s - jnp.max(s, axis=-1, keepdims=True)
        p = jnp.exp(s)
        inv_denom = pl.reciprocal(jnp.sum(p, axis=-1, keepdims=True), approx=True)
        attn = (p * inv_denom).astype(jnp.bfloat16)

        # (bt, N, N) @ (bt, N, dh) -> this head's slab straight into scratch.
        ctx_ref[:, :, h * dim_head:(h + 1) * dim_head] = jnp.einsum(
            'bqk,bkd->bqd', attn, v,
            preferred_element_type=jnp.float32).astype(jnp.bfloat16)

    # --- output projection (Linear + bias); Dropout(p=0.0) is identity. ---
    y = jnp.dot(ctx_ref[...].reshape(bt * n, inner), wout_ref[...],
                preferred_element_type=jnp.float32) + bout_ref[...]
    o_ref[...] = y.reshape(bt, n, dim).astype(o_ref.dtype)


def _pick_block_batch(batch, seq):
    """Batch elements per grid step: fill ~128 MXU rows, keep >= 2 grid steps."""
    if batch <= 1:
        return 1
    target = max(1, 128 // max(seq, 1))      # row target (v5e MXU granularity)
    target = max(1, min(target, batch // 2))  # keep grid >= 2 for 2x TensorCores
    bt = 1
    for d in range(1, target + 1):
        if batch % d == 0:
            bt = d
    return bt


def _vmem_limit_bytes(bt, n, dim, inner):
    """Generation-aware VMEM request with ~20% headroom under the physical cap."""
    try:
        phys = int(pltpu.get_tpu_info().vmem_capacity_bytes)
    except Exception:  # fall back to the smallest current generation (v7x per-TC)
        phys = 64 * 1024 * 1024
    cap = max(32 * 1024 * 1024, int(0.8 * phys))
    est = (2 * 2 * bt * n * dim * 4                              # x + o blocks (double-buffered)
           + (dim * 3 * inner + inner * dim) * 2 + dim * 4       # single-buffered bf16 weights + bias
           + bt * n * 3 * inner * 2                              # qkv scratch (bf16)
           + bt * n * inner * 2                                  # ctx scratch (bf16)
           + 4 * bt * n * n * 4                                  # score/prob f32 intermediates
           + 3 * bt * n * inner * 2)                             # transient q/k/v slices
    return int(min(cap, max(32 * 1024 * 1024, 2 * est)))


@functools.partial(jax.jit, static_argnames=("heads", "dim_head"))
def attention_pallas(x, w_qkv_t, w_out_t, b_out, *, heads, dim_head):
    """x: (B, N, dim); w_qkv_t: (dim, 3*inner); w_out_t: (inner, dim); b_out: (1, dim)."""
    B, N, dim = x.shape
    inner = heads * dim_head
    scale = dim_head ** (-0.5)

    # Fold 1/sqrt(dim_head) into the Q columns of the QKV weight (zero
    # in-kernel cost) and cast weights to bf16 (MXU-native, halves resident
    # VMEM). Under jit this prep is compiled/fused with the call.
    w_qkv_scaled = w_qkv_t.astype(jnp.float32).at[:, :inner].multiply(scale)
    w_qkv_b = w_qkv_scaled.astype(jnp.bfloat16)
    w_out_b = w_out_t.astype(jnp.bfloat16)
    b_out_f = b_out.astype(jnp.float32).reshape(1, dim)

    bt = _pick_block_batch(B, N)
    kernel = functools.partial(_attention_kernel, bt=bt, heads=heads,
                               dim_head=dim_head)

    weight_mode = pl.Buffered(1)   # grid-invariant blocks: one VMEM copy only
    return pl.pallas_call(
        kernel,
        out_shape=jax.ShapeDtypeStruct((B, N, dim), x.dtype),
        grid_spec=pltpu.PrefetchScalarGridSpec(
            num_scalar_prefetch=0,
            grid=(B // bt,),
            in_specs=[
                pl.BlockSpec((bt, N, dim), lambda b: (b, 0, 0)),
                pl.BlockSpec((dim, 3 * inner), lambda b: (0, 0),
                             pipeline_mode=weight_mode),
                pl.BlockSpec((inner, dim), lambda b: (0, 0),
                             pipeline_mode=weight_mode),
                pl.BlockSpec((1, dim), lambda b: (0, 0),
                             pipeline_mode=weight_mode),
            ],
            # TODO(synk): if dim % 128 != 0 the output stores are masked partial
            # vst; a wrapper-side lane-dense repack would improve the store path.
            out_specs=pl.BlockSpec((bt, N, dim), lambda b: (b, 0, 0)),
            scratch_shapes=[
                pltpu.VMEM((bt, N, 3 * inner), jnp.bfloat16),   # qkv (bf16)
                pltpu.VMEM((bt, N, inner), jnp.bfloat16),       # per-head context (bf16)
            ],
        ),
        compiler_params=pltpu.CompilerParams(
            dimension_semantics=("parallel",),
            vmem_limit_bytes=_vmem_limit_bytes(bt, N, dim, inner)),
    )(x, w_qkv_b, w_out_b, b_out_f)


def attention_ref(x, w_qkv_t, w_out_t, b_out, *, heads, dim_head):
    """Pure-JAX f32 reference with identical semantics to the PyTorch module."""
    B, N, dim = x.shape
    inner = heads * dim_head
    scale = dim_head ** (-0.5)
    qkv = x @ w_qkv_t                                       # (B, N, 3*inner)
    q, k, v = jnp.split(qkv, 3, axis=-1)

    def to_heads(t):                                        # 'b n (h d) -> b h n d'
        return t.reshape(B, N, heads, dim_head).transpose(0, 2, 1, 3)

    q, k, v = map(to_heads, (q, k, v))
    dots = jnp.einsum('bhnd,bhmd->bhnm', q, k) * scale
    attn = jax.nn.softmax(dots, axis=-1)
    out = jnp.einsum('bhnm,bhmd->bhnd', attn, v)
    out = out.transpose(0, 2, 1, 3).reshape(B, N, inner)    # 'b h n d -> b n (h d)'
    return out @ w_out_t + b_out


if __name__ == "__main__":
    # Small shapes consistent with the module's forward.
    B, N, dim = 2, 8, 32
    heads, dim_head = 4, 16
    inner = heads * dim_head      # 64; project_out=True since heads != 1

    key = jax.random.PRNGKey(0)
    kx, k1, k2, k3 = jax.random.split(key, 4)

    x = jax.random.normal(kx, (B, N, dim), dtype=jnp.float32)

    # Deterministic parameter init (PyTorch-style uniform bounds), stored
    # pre-transposed as (in_features, out_features).
    bound_qkv = 1.0 / (dim ** 0.5)
    w_qkv_t = jax.random.uniform(k1, (dim, 3 * inner), jnp.float32,
                                 -bound_qkv, bound_qkv)
    bound_out = 1.0 / (inner ** 0.5)
    w_out_t = jax.random.uniform(k2, (inner, dim), jnp.float32,
                                 -bound_out, bound_out)
    b_out = jax.random.uniform(k3, (1, dim), jnp.float32, -bound_out, bound_out)

    y = attention_pallas(x, w_qkv_t, w_out_t, b_out,
                         heads=heads, dim_head=dim_head)
    y = jax.block_until_ready(y)

    y_ref = attention_ref(x, w_qkv_t, w_out_t, b_out,
                          heads=heads, dim_head=dim_head)
    # bf16 MXU operands / bf16 scratches / approx reciprocal (f32 accumulation)
    # -> loosened tolerance vs the f32 reference.
    assert jnp.allclose(y, y_ref, atol=5e-2, rtol=5e-2), "mismatch vs reference"

    print("KERNEL_OK")
</pallas_src>

<mosaic_0001>
module attributes {stable_mosaic.version = 11 : i64} {
  func.func @_attention_kernel(%arg0: i32, %arg1: memref<1x8x32xf32, #tpu.memory_space<vmem>>, %arg2: memref<32x192xbf16, #tpu.memory_space<vmem>>, %arg3: memref<64x32xbf16, #tpu.memory_space<vmem>>, %arg4: memref<1x32xf32, #tpu.memory_space<vmem>>, %arg5: memref<1x8x32xf32, #tpu.memory_space<vmem>>, %arg6: memref<1x8x192xbf16, #tpu.memory_space<vmem>>, %arg7: memref<1x8x64xbf16, #tpu.memory_space<vmem>>) attributes {dimension_semantics = [#tpu.dimension_semantics<parallel>], iteration_bounds = array<i64: 2>, scalar_prefetch = 0 : i64, scratch_operands = 2 : i64, tpu.core_type = #tpu.core_type<tc>, window_params = [{transform_indices = @transform_0, window_bounds = array<i64: 1, 8, 32>}, {pipeline_mode = #tpu.pipeline_mode<synchronous>, transform_indices = @transform_1, window_bounds = array<i64: 32, 192>}, {pipeline_mode = #tpu.pipeline_mode<synchronous>, transform_indices = @transform_2, window_bounds = array<i64: 64, 32>}, {pipeline_mode = #tpu.pipeline_mode<synchronous>, transform_indices = @transform_3, window_bounds = array<i64: 1, 32>}, {transform_indices = @transform_4, window_bounds = array<i64: 1, 8, 32>}]} {
    %c0 = arith.constant 0 : index
    %c0_0 = arith.constant 0 : index
    %c0_1 = arith.constant 0 : index
    %0 = vector.load %arg1[%c0, %c0_0, %c0_1] : memref<1x8x32xf32, #tpu.memory_space<vmem>>, vector<1x8x32xf32>
    %1 = vector.shape_cast %0 : vector<1x8x32xf32> to vector<8x32xf32>
    %2 = arith.truncf %1 : vector<8x32xf32> to vector<8x32xbf16>
    %c0_2 = arith.constant 0 : index
    %c0_3 = arith.constant 0 : index
    %3 = vector.load %arg2[%c0_2, %c0_3] : memref<32x192xbf16, #tpu.memory_space<vmem>>, vector<32x192xbf16>
    %cst = arith.constant dense<0.000000e+00> : vector<8x192xf32>
    %4 = tpu.matmul %2, %3, %cst {dimension_numbers = #tpu.dot_dimension_numbers<[1], [0], [0], [1], [0, 0, 1, 1], [], []>} : vector<8x32xbf16>, vector<32x192xbf16>, vector<8x192xf32> -> vector<8x192xf32>
    %5 = arith.truncf %4 : vector<8x192xf32> to vector<8x192xbf16>
    %6 = vector.shape_cast %5 : vector<8x192xbf16> to vector<1x8x192xbf16>
    %c0_4 = arith.constant 0 : index
    %c0_5 = arith.constant 0 : index
    %c0_6 = arith.constant 0 : index
    %7 = vector.load %arg6[%c0_4, %c0_5, %c0_6] : memref<1x8x192xbf16, #tpu.memory_space<vmem>>, vector<1x8x192xbf16>
    tpu.vector_store %arg6[%c0_4, %c0_5, %c0_6], %6 {strides = array<i32>} : memref<1x8x192xbf16, #tpu.memory_space<vmem>>, vector<1x8x192xbf16>,
    %c0_7 = arith.constant 0 : index
    %c0_8 = arith.constant 0 : index
    %c0_9 = arith.constant 0 : index
    %8 = vector.load %arg6[%c0_7, %c0_8, %c0_9] : memref<1x8x192xbf16, #tpu.memory_space<vmem>>, vector<1x8x16xbf16>
    %c0_10 = arith.constant 0 : index
    %c0_11 = arith.constant 0 : index
    %c64 = arith.constant 64 : index
    %9 = vector.load %arg6[%c0_10, %c0_11, %c64] : memref<1x8x192xbf16, #tpu.memory_space<vmem>>, vector<1x8x16xbf16>
    %c0_12 = arith.constant 0 : index
    %c0_13 = arith.constant 0 : index
    %c128 = arith.constant 128 : index
    %10 = vector.load %arg6[%c0_12, %c0_13, %c128] : memref<1x8x192xbf16, #tpu.memory_space<vmem>>, vector<1x8x16xbf16>
    "tpu.trace_start"() <{level = 10 : i32, message = "bqd,bkd->bqk"}> : () -> ()
    %cst_14 = arith.constant dense<0.000000e+00> : vector<1x8x8xf32>
    %11 = tpu.matmul %8, %9, %cst_14 {dimension_numbers = #tpu.dot_dimension_numbers<[2], [2], [1], [1], [0, 0, 0, 1, 1, 1], [0], [0]>} : vector<1x8x16xbf16>, vector<1x8x16xbf16>, vector<1x8x8xf32> -> vector<1x8x8xf32>
    "tpu.trace_stop"() : () -> ()
    %cst_15 = arith.constant dense<0xFF800000> : vector<1x8xf32>
    %12 = vector.multi_reduction <maximumf>, %11, %cst_15 [2] : vector<1x8x8xf32> to vector<1x8xf32>
    %13 = vector.shape_cast %12 : vector<1x8xf32> to vector<1x8x1xf32>
    %14 = vector.broadcast %13 : vector<1x8x1xf32> to vector<1x8x8xf32>
    %15 = arith.subf %11, %14 : vector<1x8x8xf32>
    %16 = math.exp %15 : vector<1x8x8xf32>
    %cst_16 = arith.constant dense<0.000000e+00> : vector<1x8xf32>
    %17 = vector.multi_reduction <add>, %16, %cst_16 [2] : vector<1x8x8xf32> to vector<1x8xf32>
    %18 = vector.shape_cast %17 : vector<1x8xf32> to vector<1x8x1xf32>
    %19 = tpu.reciprocal %18 {approx = true} : vector<1x8x1xf32> -> vector<1x8x1xf32>
    %20 = vector.broadcast %19 : vector<1x8x1xf32> to vector<1x8x8xf32>
    %21 = arith.mulf %16, %20 : vector<1x8x8xf32>
    %22 = arith.truncf %21 : vector<1x8x8xf32> to vector<1x8x8xbf16>
    "tpu.trace_start"() <{level = 10 : i32, message = "bqk,bkd->bqd"}> : () -> ()
    %cst_17 = arith.constant dense<0.000000e+00> : vector<1x8x16xf32>
    %23 = tpu.matmul %22, %10, %cst_17 {dimension_numbers = #tpu.dot_dimension_numbers<[2], [1], [1], [2], [0, 0, 0, 1, 1, 2], [0], [0]>} : vector<1x8x8xbf16>, vector<1x8x16xbf16>, vector<1x8x16xf32> -> vector<1x8x16xf32>
    "tpu.trace_stop"() : () -> ()
    %24 = arith.truncf %23 : vector<1x8x16xf32> to vector<1x8x16xbf16>
    %c0_18 = arith.constant 0 : index
    %c0_19 = arith.constant 0 : index
    %c0_20 = arith.constant 0 : index
    %25 = vector.load %arg7[%c0_18, %c0_19, %c0_20] : memref<1x8x64xbf16, #tpu.memory_space<vmem>>, vector<1x8x16xbf16>
    tpu.vector_store %arg7[%c0_18, %c0_19, %c0_20], %24 {strides = array<i32>} : memref<1x8x64xbf16, #tpu.memory_space<vmem>>, vector<1x8x16xbf16>,
    %c0_21 = arith.constant 0 : index
    %c0_22 = arith.constant 0 : index
    %c16 = arith.constant 16 : index
    %26 = vector.load %arg6[%c0_21, %c0_22, %c16] : memref<1x8x192xbf16, #tpu.memory_space<vmem>>, vector<1x8x16xbf16>
    %c0_23 = arith.constant 0 : index
    %c0_24 = arith.constant 0 : index
    %c80 = arith.constant 80 : index
    %27 = vector.load %arg6[%c0_23, %c0_24, %c80] : memref<1x8x192xbf16, #tpu.memory_space<vmem>>, vector<1x8x16xbf16>
    %c0_25 = arith.constant 0 : index
    %c0_26 = arith.constant 0 : index
    %c144 = arith.constant 144 : index
    %28 = vector.load %arg6[%c0_25, %c0_26, %c144] : memref<1x8x192xbf16, #tpu.memory_space<vmem>>, vector<1x8x16xbf16>
    "tpu.trace_start"() <{level = 10 : i32, message = "bqd,bkd->bqk"}> : () -> ()
    %cst_27 = arith.constant dense<0.000000e+00> : vector<1x8x8xf32>
    %29 = tpu.matmul %26, %27, %cst_27 {dimension_numbers = #tpu.dot_dimension_numbers<[2], [2], [1], [1], [0, 0, 0, 1, 1, 1], [0], [0]>} : vector<1x8x16xbf16>, vector<1x8x16xbf16>, vector<1x8x8xf32> -> vector<1x8x8xf32>
    "tpu.trace_stop"() : () -> ()
    %cst_28 = arith.constant dense<0xFF800000> : vector<1x8xf32>
    %30 = vector.multi_reduction <maximumf>, %29, %cst_28 [2] : vector<1x8x8xf32> to vector<1x8xf32>
    %31 = vector.shape_cast %30 : vector<1x8xf32> to vector<1x8x1xf32>
    %32 = vector.broadcast %31 : vector<1x8x1xf32> to vector<1x8x8xf32>
    %33 = arith.subf %29, %32 : vector<1x8x8xf32>
    %34 = math.exp %33 : vector<1x8x8xf32>
    %cst_29 = arith.constant dense<0.000000e+00> : vector<1x8xf32>
    %35 = vector.multi_reduction <add>, %34, %cst_29 [2] : vector<1x8x8xf32> to vector<1x8xf32>
    %36 = vector.shape_cast %35 : vector<1x8xf32> to vector<1x8x1xf32>
    %37 = tpu.reciprocal %36 {approx = true} : vector<1x8x1xf32> -> vector<1x8x1xf32>
    %38 = vector.broadcast %37 : vector<1x8x1xf32> to vector<1x8x8xf32>
    %39 = arith.mulf %34, %38 : vector<1x8x8xf32>
    %40 = arith.truncf %39 : vector<1x8x8xf32> to vector<1x8x8xbf16>
    "tpu.trace_start"() <{level = 10 : i32, message = "bqk,bkd->bqd"}> : () -> ()
    %cst_30 = arith.constant dense<0.000000e+00> : vector<1x8x16xf32>
    %41 = tpu.matmul %40, %28, %cst_30 {dimension_numbers = #tpu.dot_dimension_numbers<[2], [1], [1], [2], [0, 0, 0, 1, 1, 2], [0], [0]>} : vector<1x8x8xbf16>, vector<1x8x16xbf16>, vector<1x8x16xf32> -> vector<1x8x16xf32>
    "tpu.trace_stop"() : () -> ()
    %42 = arith.truncf %41 : vector<1x8x16xf32> to vector<1x8x16xbf16>
    %c0_31 = arith.constant 0 : index
    %c0_32 = arith.constant 0 : index
    %c16_33 = arith.constant 16 : index
    %43 = vector.load %arg7[%c0_31, %c0_32, %c16_33] : memref<1x8x64xbf16, #tpu.memory_space<vmem>>, vector<1x8x16xbf16>
    tpu.vector_store %arg7[%c0_31, %c0_32, %c16_33], %42 {strides = array<i32>} : memref<1x8x64xbf16, #tpu.memory_space<vmem>>, vector<1x8x16xbf16>,
    %c0_34 = arith.constant 0 : index
    %c0_35 = arith.constant 0 : index
    %c32 = arith.constant 32 : index
    %44 = vector.load %arg6[%c0_34, %c0_35, %c32] : memref<1x8x192xbf16, #tpu.memory_space<vmem>>, vector<1x8x16xbf16>
    %c0_36 = arith.constant 0 : index
    %c0_37 = arith.constant 0 : index
    %c96 = arith.constant 96 : index
    %45 = vector.load %arg6[%c0_36, %c0_37, %c96] : memref<1x8x192xbf16, #tpu.memory_space<vmem>>, vector<1x8x16xbf16>
    %c0_38 = arith.constant 0 : index
    %c0_39 = arith.constant 0 : index
    %c160 = arith.constant 160 : index
    %46 = vector.load %arg6[%c0_38, %c0_39, %c160] : memref<1x8x192xbf16, #tpu.memory_space<vmem>>, vector<1x8x16xbf16>
    "tpu.trace_start"() <{level = 10 : i32, message = "bqd,bkd->bqk"}> : () -> ()
    %cst_40 = arith.constant dense<0.000000e+00> : vector<1x8x8xf32>
    %47 = tpu.matmul %44, %45, %cst_40 {dimension_numbers = #tpu.dot_dimension_numbers<[2], [2], [1], [1], [0, 0, 0, 1, 1, 1], [0], [0]>} : vector<1x8x16xbf16>, vector<1x8x16xbf16>, vector<1x8x8xf32> -> vector<1x8x8xf32>
    "tpu.trace_stop"() : () -> ()
    %cst_41 = arith.constant dense<0xFF800000> : vector<1x8xf32>
    %48 = vector.multi_reduction <maximumf>, %47, %cst_41 [2] : vector<1x8x8xf32> to vector<1x8xf32>
    %49 = vector.shape_cast %48 : vector<1x8xf32> to vector<1x8x1xf32>
    %50 = vector.broadcast %49 : vector<1x8x1xf32> to vector<1x8x8xf32>
    %51 = arith.subf %47, %50 : vector<1x8x8xf32>
    %52 = math.exp %51 : vector<1x8x8xf32>
    %cst_42 = arith.constant dense<0.000000e+00> : vector<1x8xf32>
    %53 = vector.multi_reduction <add>, %52, %cst_42 [2] : vector<1x8x8xf32> to vector<1x8xf32>
    %54 = vector.shape_cast %53 : vector<1x8xf32> to vector<1x8x1xf32>
    %55 = tpu.reciprocal %54 {approx = true} : vector<1x8x1xf32> -> vector<1x8x1xf32>
    %56 = vector.broadcast %55 : vector<1x8x1xf32> to vector<1x8x8xf32>
    %57 = arith.mulf %52, %56 : vector<1x8x8xf32>
    %58 = arith.truncf %57 : vector<1x8x8xf32> to vector<1x8x8xbf16>
    "tpu.trace_start"() <{level = 10 : i32, message = "bqk,bkd->bqd"}> : () -> ()
    %cst_43 = arith.constant dense<0.000000e+00> : vector<1x8x16xf32>
    %59 = tpu.matmul %58, %46, %cst_43 {dimension_numbers = #tpu.dot_dimension_numbers<[2], [1], [1], [2], [0, 0, 0, 1, 1, 2], [0], [0]>} : vector<1x8x8xbf16>, vector<1x8x16xbf16>, vector<1x8x16xf32> -> vector<1x8x16xf32>
    "tpu.trace_stop"() : () -> ()
    %60 = arith.truncf %59 : vector<1x8x16xf32> to vector<1x8x16xbf16>
    %c0_44 = arith.constant 0 : index
    %c0_45 = arith.constant 0 : index
    %c32_46 = arith.constant 32 : index
    %61 = vector.load %arg7[%c0_44, %c0_45, %c32_46] : memref<1x8x64xbf16, #tpu.memory_space<vmem>>, vector<1x8x16xbf16>
    tpu.vector_store %arg7[%c0_44, %c0_45, %c32_46], %60 {strides = array<i32>} : memref<1x8x64xbf16, #tpu.memory_space<vmem>>, vector<1x8x16xbf16>,
    %c0_47 = arith.constant 0 : index
    %c0_48 = arith.constant 0 : index
    %c48 = arith.constant 48 : index
    %62 = vector.load %arg6[%c0_47, %c0_48, %c48] : memref<1x8x192xbf16, #tpu.memory_space<vmem>>, vector<1x8x16xbf16>
    %c0_49 = arith.constant 0 : index
    %c0_50 = arith.constant 0 : index
    %c112 = arith.constant 112 : index
    %63 = vector.load %arg6[%c0_49, %c0_50, %c112] : memref<1x8x192xbf16, #tpu.memory_space<vmem>>, vector<1x8x16xbf16>
    %c0_51 = arith.constant 0 : index
    %c0_52 = arith.constant 0 : index
    %c176 = arith.constant 176 : index
    %64 = vector.load %arg6[%c0_51, %c0_52, %c176] : memref<1x8x192xbf16, #tpu.memory_space<vmem>>, vector<1x8x16xbf16>
    "tpu.trace_start"() <{level = 10 : i32, message = "bqd,bkd->bqk"}> : () -> ()
    %cst_53 = arith.constant dense<0.000000e+00> : vector<1x8x8xf32>
    %65 = tpu.matmul %62, %63, %cst_53 {dimension_numbers = #tpu.dot_dimension_numbers<[2], [2], [1], [1], [0, 0, 0, 1, 1, 1], [0], [0]>} : vector<1x8x16xbf16>, vector<1x8x16xbf16>, vector<1x8x8xf32> -> vector<1x8x8xf32>
    "tpu.trace_stop"() : () -> ()
    %cst_54 = arith.constant dense<0xFF800000> : vector<1x8xf32>
    %66 = vector.multi_reduction <maximumf>, %65, %cst_54 [2] : vector<1x8x8xf32> to vector<1x8xf32>
    %67 = vector.shape_cast %66 : vector<1x8xf32> to vector<1x8x1xf32>
    %68 = vector.broadcast %67 : vector<1x8x1xf32> to vector<1x8x8xf32>
    %69 = arith.subf %65, %68 : vector<1x8x8xf32>
    %70 = math.exp %69 : vector<1x8x8xf32>
    %cst_55 = arith.constant dense<0.000000e+00> : vector<1x8xf32>
    %71 = vector.multi_reduction <add>, %70, %cst_55 [2] : vector<1x8x8xf32> to vector<1x8xf32>
    %72 = vector.shape_cast %71 : vector<1x8xf32> to vector<1x8x1xf32>
    %73 = tpu.reciprocal %72 {approx = true} : vector<1x8x1xf32> -> vector<1x8x1xf32>
    %74 = vector.broadcast %73 : vector<1x8x1xf32> to vector<1x8x8xf32>
    %75 = arith.mulf %70, %74 : vector<1x8x8xf32>
    %76 = arith.truncf %75 : vector<1x8x8xf32> to vector<1x8x8xbf16>
    "tpu.trace_start"() <{level = 10 : i32, message = "bqk,bkd->bqd"}> : () -> ()
    %cst_56 = arith.constant dense<0.000000e+00> : vector<1x8x16xf32>
    %77 = tpu.matmul %76, %64, %cst_56 {dimension_numbers = #tpu.dot_dimension_numbers<[2], [1], [1], [2], [0, 0, 0, 1, 1, 2], [0], [0]>} : vector<1x8x8xbf16>, vector<1x8x16xbf16>, vector<1x8x16xf32> -> vector<1x8x16xf32>
    "tpu.trace_stop"() : () -> ()
    %78 = arith.truncf %77 : vector<1x8x16xf32> to vector<1x8x16xbf16>
    %c0_57 = arith.constant 0 : index
    %c0_58 = arith.constant 0 : index
    %c48_59 = arith.constant 48 : index
    %79 = vector.load %arg7[%c0_57, %c0_58, %c48_59] : memref<1x8x64xbf16, #tpu.memory_space<vmem>>, vector<1x8x16xbf16>
    tpu.vector_store %arg7[%c0_57, %c0_58, %c48_59], %78 {strides = array<i32>} : memref<1x8x64xbf16, #tpu.memory_space<vmem>>, vector<1x8x16xbf16>,
    %c0_60 = arith.constant 0 : index
    %c0_61 = arith.constant 0 : index
    %c0_62 = arith.constant 0 : index
    %80 = vector.load %arg7[%c0_60, %c0_61, %c0_62] : memref<1x8x64xbf16, #tpu.memory_space<vmem>>, vector<1x8x64xbf16>
    %81 = vector.shape_cast %80 : vector<1x8x64xbf16> to vector<8x64xbf16>
    %c0_63 = arith.constant 0 : index
    %c0_64 = arith.constant 0 : index
    %82 = vector.load %arg3[%c0_63, %c0_64] : memref<64x32xbf16, #tpu.memory_space<vmem>>, vector<64x32xbf16>
    %cst_65 = arith.constant dense<0.000000e+00> : vector<8x32xf32>
    %83 = tpu.matmul %81, %82, %cst_65 {dimension_numbers = #tpu.dot_dimension_numbers<[1], [0], [0], [1], [0, 0, 1, 1], [], []>} : vector<8x64xbf16>, vector<64x32xbf16>, vector<8x32xf32> -> vector<8x32xf32>
    %c0_66 = arith.constant 0 : index
    %c0_67 = arith.constant 0 : index
    %84 = vector.load %arg4[%c0_66, %c0_67] : memref<1x32xf32, #tpu.memory_space<vmem>>, vector<1x32xf32>
    %85 = vector.broadcast %84 : vector<1x32xf32> to vector<8x32xf32>
    %86 = arith.addf %83, %85 : vector<8x32xf32>
    %87 = vector.shape_cast %86 : vector<8x32xf32> to vector<1x8x32xf32>
    %c0_68 = arith.constant 0 : index
    %c0_69 = arith.constant 0 : index
    %c0_70 = arith.constant 0 : index
    %88 = vector.load %arg5[%c0_68, %c0_69, %c0_70] : memref<1x8x32xf32, #tpu.memory_space<vmem>>, vector<1x8x32xf32>
    tpu.vector_store %arg5[%c0_68, %c0_69, %c0_70], %87 {strides = array<i32>} : memref<1x8x32xf32, #tpu.memory_space<vmem>>, vector<1x8x32xf32>,
    return
  }
  func.func @transform_0(%arg0: i32) -> (i32, i32, i32) {
    %c0_i32 = arith.constant 0 : i32
    %c0_i32_0 = arith.constant 0 : i32
    %c0_i32_1 = arith.constant 0 : i32
    return %arg0, %c0_i32, %c0_i32_0 : i32, i32, i32
  }
  func.func @transform_1(%arg0: i32) -> (i32, i32) {
    %c0_i32 = arith.constant 0 : i32
    %c0_i32_0 = arith.constant 0 : i32
    %c0_i32_1 = arith.constant 0 : i32
    return %c0_i32, %c0_i32_0 : i32, i32
  }
  func.func @transform_2(%arg0: i32) -> (i32, i32) {
    %c0_i32 = arith.constant 0 : i32
    %c0_i32_0 = arith.constant 0 : i32
    %c0_i32_1 = arith.constant 0 : i32
    return %c0_i32, %c0_i32_0 : i32, i32
  }
  func.func @transform_3(%arg0: i32) -> (i32, i32) {
    %c0_i32 = arith.constant 0 : i32
    %c0_i32_0 = arith.constant 0 : i32
    %c0_i32_1 = arith.constant 0 : i32
    return %c0_i32, %c0_i32_0 : i32, i32
  }
  func.func @transform_4(%arg0: i32) -> (i32, i32, i32) {
    %c0_i32 = arith.constant 0 : i32
    %c0_i32_0 = arith.constant 0 : i32
    %c0_i32_1 = arith.constant 0 : i32
    return %arg0, %c0_i32, %c0_i32_0 : i32, i32, i32
  }
}

</mosaic_0001>

<bundles_post_ra>
// kernel: attention_pallas.1
= control target key start
LH: loop header
LB: loop body
LE: loop exit
PB: predicated region body
PF: predicated region fallthrough
CT: control target
= control target key end

     0   :  { %9 = vsyncpa [#allocation5], 0  ;;  %s1435_s0 = inlined_call_operand.vmem [shape: f32[2,8,32], index: 0, kind: input, shape index: {}]   ;;  %s1436_s1 = inlined_call_operand.vmem [shape: bf16[32,192], index: 1, kind: input, shape index: {}]   ;;  %s1437_s2 = inlined_call_operand.vmem [shape: bf16[64,32], index: 2, kind: input, shape index: {}]   ;;  %s1438_s3 = inlined_call_operand.vmem [shape: f32[1,32], index: 3, kind: input, shape index: {}]   ;;  %s1439_s4 = inlined_call_operand.hbm [shape: f32[2,8,32], index: 4, kind: output, shape index: {}]  }
   0x1   :  { %11 = vsyncpa [#allocation5 + $0x1], 0  ;;  %s1239_s15 = smov 0   ;;  %s1241_s16 = smov 0  }
   0x2   :  { %s1243_s17 = smov 0   ;;  %s1245_s18 = smov 0  }
   0x3 LB: > { %s1260_s19 = sadd.s32 4294967295, %s1201_s18   ;;  %s932_s20 = sadd.s32 4294967294, %s1201_s18   ;;  %s1201_s18 = sphi %s1245_s18, %s1445_s18   ;;  %s1197_s17 = sphi %s1243_s17, %s1444_s17   ;;  %s1193_s16 = sphi %s1241_s16, %s1443_s16   ;;  %s1189_s15 = sphi %s1239_s15, %s1442_s15  }
   0x4   : > { %s1264_s21 = sadd.s32 1, %s1201_s18   ;;  %s113_s22 = sadd.s32 1, %s1197_s17 }
   0x5   : > { %s110_s23 = ssub.s32 %s1201_s18, %s1264_s21  ;;  %p123_p0 = scmp.ne.s32.totalorder %s1197_s17, %s1193_s16 }
   0x6   : > { %p111_p1 = scmp.eq.s32.totalorder %s110_s23, 0  ;;  %p124_p2 = scmp.eq.s32.totalorder %s1260_s19, 1 }
   0x7   : > { %p129_p3 = scmp.ne.s32.totalorder %s1193_s16, %s1189_s15  ;;  %p130_p4 = scmp.eq.s32.totalorder %s932_s20, 1 }
   0x8   : > { %s1275_s24 = scalar_select %p111_p1, %s1197_s17, %s113_s22  }
   0x9   : > { %p1277_p5 = por %p124_p2, %p123_p0  ;;  %p1281_p6 = por %p130_p4, %p129_p3 }
   0xa   : > { %p935_p7 = scmp.ge.s32.totalorder %s1201_s18, 1  ;;  %p164_p8 = scmp.lt.s32.totalorder %s1201_s18, 3 }
   0xc   : > { %p165_p9 = pnand %p935_p7, %p164_p8 }
   0xd   : > { %v1106_v0 = vld [vmem:[%s1436_s1 + $0x4] ss:$8 sps:$4 sm:$0xff] (!%p165_p9)   ;;  %p189_p10 = scmp.lt.s32.totalorder (!%p165_p9), %s1260_s19, 1  ;;  %v1108_v1 = vld [vmem:[%s1436_s1] ss:$8 sps:$4 sm:$0xff] (!%p165_p9)   ;;  %v1203_v2 = vmov (!%p165_p9), 0  }
   0xe   : > { %168 = sbr.rel (%p165_p9) target bundleno = 1531 (0x5fb), region = 36  ;;  %256 = vmatprep.mubr.bf16.mxu0 (!%p165_p9), %v1203_v2  ;;  %224 = vmatprep.subr.bf16.mxu0 (!%p165_p9), %v1106_v0  ;;  %v1109_v3 = vld [vmem:[%s1436_s1 + $0x14] ss:$8 sps:$4 sm:$0xff] (!%p165_p9)   ;;  %v1111_v4 = vld [vmem:[%s1436_s1 + $0x10] ss:$8 sps:$4 sm:$0xff] (!%p165_p9)   ;;  %vm220_vm0 = vcmask (!%p165_p9), 261120  }
   0xf   : > { %225 = vmatpush1.bf16.msra.mxu0 (!%p165_p9), %v1108_v1  ;;  %v1204_v7 = vmov (!%p165_p9), 0.0   ;;  %vm273_vm1 = vcmask (!%p165_p9), 1043456   ;;  %vm274_vm2 = vcmask (!%p165_p9), 523268   ;;  %vm1205_vm4 = vmmov (!%p165_p9), 0   ;;  %s1206_s14 = smov (!%p165_p9), 112   ;;  %s1207_s20 = smov (!%p165_p9), 64  }
  0x10   : > { %226 = vmatprep.subr.bf16.mxu0 (!%p165_p9), %v1109_v3  ;;  %997 = vmatprep.subr.bf16.mxu1 (!%p165_p9), %v1204_v7  ;;  %vm275_vm3 = vmor (!%p165_p9), %vm274_vm2, %vm273_vm1  ;;  %s1208_s22 = smov (!%p165_p9), 32   ;;  %s1209_s23 = smov (!%p165_p9), 48   ;;  %vm284_vm5 = vcmask (!%p165_p9), 130048   ;;  %vm331_vm6 = vcmask (!%p165_p9), 64512   ;;  %vm391_vm7 = vcmask (!%p165_p9), 125952   ;;  %vm518_vm8 = vcmask (!%p165_p9), 257152  }
  0x11   : > { %999 = vmatprep.mubr.msk.bf16.mxu1 (!%p165_p9), %vm1205_vm4, %v1204_v7  ;;  %s1210_s27 = smov (!%p165_p9), 16   ;;  %s1211_s28 = smov (!%p165_p9), 96   ;;  %vm645_vm9 = vcmask (!%p165_p9), 388352   ;;  %vm772_vm10 = vcmask (!%p165_p9), 519552   ;;  %vm814_vm11 = vcmask (!%p165_p9), 523264  }
  0x12   : > { %s1212_s29 = smov (!%p165_p9), 80   ;;  %s186_s12 = sand.u32 (!%p165_p9), 1, %s1193_s16  }
  0x13   : > { %227 = vmatpush1.bf16.msra.mxu0 (!%p165_p9), %v1111_v4  ;;  %s1213_s6 = smov (!%p165_p9), [#allocation4]  }
  0x14   : > { %1003 = vmatprep.subr.bf16.mxu0 (!%p165_p9), %v1204_v7  ;;  %s1143_s7 = sshll.u32 (!%p165_p9), %s1213_s6, 4  ;;  %s1144_s7 = int_to_ptr.vmem [resolvable:$false] %s1143_s7 }
  0x15   : > { %s190_s9 = scalar_select %p189_p10, %s1260_s19, 1 }
  0x16   : > { %s1145_s8 = scalar_lea.vmem %s1144_s7, 256 }
  0x17   : > { %s937_s10 = sshll.u32 %s190_s9, 3 }
  0x18   : > { %s192_s13 = scalar_lea.vmem %s1435_s0, %s937_s10 }
  0x19   : > { %v194_v5 = vld [vmem:[%s192_s13] sm:$0xff]  ;;  %s936_s13 = sshll.u32 %s186_s12, 3 }
  0x1a   : > { %v195_v6 = vpack.c.bf16 %v194_v5, %v194_v5 }
  0x1c   : > { %942 = vmatmul.mubr.msk.bf16.vlgmr.msra.gmra.mrb[0].mxu0 %vm220_vm0, %v195_v6 }
  0x1d   : > { %1005 = vmatprep.mubr.msk.bf16.mxu0 %vm1205_vm4, %v1204_v7 }
  0xef   : > { %v258_v8 = vpop.f32.mrb[0].mxu0 }
  0xf0   : > { %v260_v9 = vpop.f32.mrb[1].mxu0 }
  0xf1   : > { %v972_v10 = vpack.c.bf16 %v260_v9, %v258_v8  ;;  %v262_v11 = vpop.f32.mrb[2].mxu0 }
  0xf2   : > { %v263_v12 = vpop.f32.mrb[3].mxu0 }
  0xf3   : > { %276 = vst.msk [vmem:[#allocation2] sm:$0xff] %vm275_vm3, %v972_v10 }
  0xfa   : > { %v278_v13 = vld [vmem:[#allocation2 + $0x4] sm:$0xf]  ;;  %v1112_v14 = vld [vmem:[#allocation2] ss:$0 sps:$4 sm:$0xff]  }
  0xfb   : > { %v348_v15 = vsel %vm273_vm1, %v278_v13, 0  ;;  %v277_v16 = vld [vmem:[#allocation2] sm:$0xf]  ;;  %398 = vrot.lane.b32.xlu1 %v1112_v14, %s1206_s14  ;;  %v1116_v2 = vld [vmem:[#allocation2 + $0x4] ss:$0 sps:$4 sm:$0xff]  }
  0xfc   : > { %1004 = vmatpush3.bf16.msra.mxu0 %v348_v15  ;;  %v944_v17 = vcombine.low %v277_v16, %v277_v16  ;;  %v1114_v18 = vld [vmem:[#allocation2] ss:$0 sps:$4 sm:$0xff]   ;;  %v1117_v4 = vld [vmem:[#allocation2 + $0x4] ss:$0 sps:$4 sm:$0xff]  }
  0xfd   : > { %1015 = vmatprep.subr.bf16.mxu0 %v1204_v7  ;;  %v1115_v19 = vld [vmem:[#allocation2] ss:$0 sps:$4 sm:$0xff]   ;;  %v1118_v10 = vld [vmem:[#allocation2 + $0x4] ss:$0 sps:$4 sm:$0xff]  }
  0xfe   : > { %282 = vrot.lane.b32.xlu0 %v944_v17, %s1207_s20 }
  0xff   : > { %527 = vrot.lane.b32.xlu1 %v1114_v18, %s1208_s22 }
 0x102   : > { %400 = vrot.lane.b32.xlu0 %v1112_v14, %s1209_s23 }
 0x103   : > { %654 = vrot.lane.b32.xlu1 %v1115_v19, %s1210_s27 }
 0x106   : > { %525 = vrot.lane.b32.xlu0 %v1114_v18, %s1211_s28 }
 0x10a   : > { %652 = vrot.lane.b32.xlu0 %v1115_v19, %s1212_s29 }
 0x16d   : > { %v399_v23 = vpop.permute.xlu1 %398 }
 0x170   : > { %v283_v20 = vpop.permute.xlu0 %282 }
 0x171   : > { %v289_v21 = vsel %vm284_vm5, %v283_v20, 0  ;;  %v528_v25 = vpop.permute.xlu1 %527 }
 0x172   : > { %998 = vmatpush3.bf16.xpose.msra.mxu1 %v289_v21  ;;  %v533_v26 = vsel %vm284_vm5, %v528_v25, 0 }
 0x173   : > { %1009 = vmatprep.subr.bf16.mxu1 %v1204_v7 }
 0x174   : > { %v401_v22 = vpop.permute.xlu0 %400 }
 0x175   : > { %v406_v24 = vsel %vm284_vm5, %v401_v22, 0  ;;  %v655_v27 = vpop.permute.xlu1 %654 }
 0x176   : > { %v660_v29 = vsel %vm284_vm5, %v655_v27, 0 }
 0x178   : > { %v526_v28 = vpop.permute.xlu0 %525 }
 0x179   : > { %1000 = vmatmul.mubr.msk.bf16.vlgmr.msra.gmra.mrb[0].mxu1 %vm284_vm5, %v277_v16 }
 0x17a   : > { %1010 = vmatpush3.bf16.xpose.msra.mxu1 %v406_v24  ;;  %1011 = vmatprep.mubr.msk.bf16.mxu1 %vm1205_vm4, %v1204_v7 }
 0x17b   : > { %1021 = vmatprep.subr.bf16.mxu1 %v1204_v7 }
 0x17c   : > { %v653_v30 = vpop.permute.xlu0 %652 }
 0x181   : > { %1012 = vmatmul.mubr.msk.bf16.vlgmr.msra.gmra.mrb[4].mxu1 %vm284_vm5, %v399_v23 }
 0x182   : > { %1022 = vmatpush3.bf16.xpose.msra.mxu1 %v533_v26  ;;  %1023 = vmatprep.mubr.msk.bf16.mxu1 %vm1205_vm4, %v1204_v7 }
 0x183   : > { %1033 = vmatprep.subr.bf16.mxu1 %v1204_v7 }
 0x189   : > { %1024 = vmatmul.mubr.msk.bf16.vlgmr.msra.gmra.mrb[8].mxu1 %vm284_vm5, %v526_v28 }
 0x18a   : > { %1034 = vmatpush3.bf16.xpose.msra.mxu1 %v660_v29  ;;  %1035 = vmatprep.mubr.msk.bf16.mxu1 %vm1205_vm4, %v1204_v7 }
 0x18b   : > { %1045 = vmatprep.subr.bf16.mxu1 %v1204_v7 }
 0x191   : > { %1036 = vmatmul.mubr.msk.bf16.vlgmr.msra.gmra.mrb[12].mxu1 %vm284_vm5, %v653_v30 }
 0x192   : > { %1053 = vmatprep.mubr.msk.bf16.mxu1 %vm1205_vm4, %v1204_v7 }
 0x24c   : > { %v325_v31 = vpop.f32.mrb[0].mxu1 }
 0x24d   : > { %v1001_v32 = vpop.f32.mrb[1].mxu1  ;;  %v332_v33 = vsel %vm331_vm6, %v325_v31, -inf }
 0x24e   : > { %333 = vmax.xlane.f32.xlu1 %v332_v33  ;;  %v328_v34 = vpop.f32.mrb[2].mxu1 }
 0x24f   : > { %v1002_v35 = vpop.f32.mrb[3].mxu1 }
 0x254   : > { %v442_v36 = vpop.f32.mrb[4].mxu1 }
 0x255   : > { %v1013_v37 = vpop.f32.mrb[5].mxu1  ;;  %v448_v38 = vsel %vm331_vm6, %v442_v36, -inf }
 0x256   : > { %449 = vmax.xlane.f32.xlu0 %v448_v38  ;;  %v445_v39 = vpop.f32.mrb[6].mxu1  ;;  %v1119_v38 = vld [vmem:[%s1437_s2] sm:$0xff]  }
 0x257   : > { %v1014_v40 = vpop.f32.mrb[7].mxu1  ;;  %1046 = vmatpush3.bf16.msra.mxu1 %v1119_v38 }
 0x258   : > { %v1120_v40 = vld [vmem:[%s1437_s2 + $0x8] sm:$0xff]   ;;  %1047 = vmatprep.subr.bf16.mxu1 %v1204_v7 }
 0x25b   : > { %1048 = vmatpush3.bf16.msra.mxu1 %v1120_v40 }
 0x25c   : > { %v569_v41 = vpop.f32.mrb[8].mxu1  ;;  %1049 = vmatprep.subr.bf16.mxu1 %v1204_v7 }
 0x25d   : > { %v1025_v42 = vpop.f32.mrb[9].mxu1  ;;  %v575_v43 = vsel %vm331_vm6, %v569_v41, -inf }
 0x25e   : > { %576 = vmax.xlane.f32.xlu0 %v575_v43  ;;  %v572_v44 = vpop.f32.mrb[10].mxu1 }
 0x25f   : > { %v1026_v45 = vpop.f32.mrb[11].mxu1 }
 0x264   : > { %v696_v46 = vpop.f32.mrb[12].mxu1 }
 0x265   : > { %v1037_v47 = vpop.f32.mrb[13].mxu1  ;;  %v702_v48 = vsel %vm331_vm6, %v696_v46, -inf }
 0x266   : > { %703 = vmax.xlane.f32.xlu1 %v702_v48  ;;  %v699_v49 = vpop.f32.mrb[14].mxu1 }
 0x267   : > { %v1038_v50 = vpop.f32.mrb[15].mxu1 }
 0x268   : > { %v1121_v50 = vld [vmem:[%s1437_s2 + $0x10] sm:$0xff]  }
 0x269   : > { %1050 = vmatpush3.bf16.msra.mxu1 %v1121_v50 }
 0x26a   : > { %1051 = vmatprep.subr.bf16.mxu1 %v1204_v7 }
 0x2db   : > { %v334_v51 = vpop.xlane.xlu1 %333 }
 0x2dc   : > { %v335_v52 = vsub.f32 %v325_v31, %v334_v51  ;;  %v1122_v51 = vld [vmem:[%s1437_s2 + $0x18] sm:$0xff]  }
 0x2dd   : > { %1052 = vmatpush3.bf16.msra.mxu1 %v1122_v51 }
 0x2de   : > { %v336_v53 = vmul.f32 1.442695, %v335_v52 }
 0x2e0   : > { %1123 = vpow2.f32 %v336_v53 }
 0x2e3   : > { %v450_v54 = vpop.xlane.xlu0 %449 }
 0x2e4   : > { %v451_v55 = vsub.f32 %v442_v36, %v450_v54 }
 0x2e6   : > { %v452_v56 = vmul.f32 1.442695, %v451_v55 }
 0x2e8   : > { %1125 = vpow2.f32 %v452_v56 }
 0x2ea   : > { %v1124_v57 = vpop.eup %1123 }
 0x2eb   : > { %v577_v58 = vpop.xlane.xlu0 %576  ;;  %v338_v59 = vsel %vm331_vm6, %v1124_v57, 0.0 }
 0x2ec   : > { %v578_v60 = vsub.f32 %v569_v41, %v577_v58  ;;  %339 = vadd.xlane.f32.xlu0 %v338_v59 }
 0x2ee   : > { %v579_v61 = vmul.f32 1.442695, %v578_v60  ;;  %v962_v60 = vld [vmem:[%s1438_s3] ss:$0 sm:$0xff] }
 0x2f0   : > { %1127 = vpow2.f32 %v579_v61 }
 0x2f2   : > { %v1126_v62 = vpop.eup %1125 }
 0x2f3   : > { %v454_v63 = vsel %vm331_vm6, %v1126_v62, 0.0  ;;  %v704_v3 = vpop.xlane.xlu1 %703 }
 0x2f4   : > { %455 = vadd.xlane.f32.xlu1 %v454_v63  ;;  %v705_v5 = vsub.f32 %v696_v46, %v704_v3 }
 0x2f6   : > { %v706_v6 = vmul.f32 1.442695, %v705_v5 }
 0x2f8   : > { %1129 = vpow2.f32 %v706_v6 }
 0x2fa   : > { %v1128_v0 = vpop.eup %1127 }
 0x2fb   : > { %v581_v1 = vsel %vm331_vm6, %v1128_v0, 0.0 }
 0x2fc   : > { %582 = vadd.xlane.f32.xlu0 %v581_v1 }
 0x302   : > { %v1130_v8 = vpop.eup %1129 }
 0x303   : > { %v708_v9 = vsel %vm331_vm6, %v1130_v8, 0.0 }
 0x305   : > { %590 = vrot.lane.b32.xlu1 %v1116_v2, %s1211_s28 }
 0x312   : > { %463 = vrot.lane.b32.xlu0 %v1117_v4, %s1206_s14 }
 0x329   : > { %709 = vadd.xlane.f32.xlu1 %v708_v9 }
 0x33a   : > { %717 = vrot.lane.b32.xlu1 %v1118_v10, %s1212_s29 }
 0x379   : > { %v340_v11 = vpop.xlane.xlu0 %339 }
 0x37a   : > { %1131 = vrcp.f32 %v340_v11 }
 0x381   : > { %v456_v12 = vpop.xlane.xlu1 %455 }
 0x382   : > { %1133 = vrcp.f32 %v456_v12 }
 0x384   : > { %v1132_v13 = vpop.eup %1131 }
 0x385   : > { %v342_v14 = vmul.f32 %v1132_v13, %v1124_v57  ;;  %v591_v21 = vpop.permute.xlu1 %590 }
 0x386   : > { %v596_v23 = vsel %vm273_vm1, %v591_v21, 0 }
 0x387   : > { %v343_v15 = vpack.c.bf16 %v342_v14, %v342_v14 }
 0x389   : > { %1006 = vmatmul.mubr.msk.bf16.vlgmr.msra.gmra.mrb[4].mxu0 %vm331_vm6, %v343_v15  ;;  %v583_v16 = vpop.xlane.xlu0 %582 }
 0x38a   : > { %1135 = vrcp.f32 %v583_v16  ;;  %1017 = vmatprep.mubr.msk.bf16.mxu0 %vm1205_vm4, %v1204_v7 }
 0x38c   : > { %v1134_v17 = vpop.eup %1133 }
 0x38d   : > { %v458_v18 = vmul.f32 %v1134_v17, %v1126_v62  ;;  %v464_v19 = vpop.permute.xlu0 %463 }
 0x38e   : > { %v469_v20 = vsel %vm273_vm1, %v464_v19, 0 }
 0x38f   : > { %1016 = vmatpush3.bf16.msra.mxu0 %v469_v20  ;;  %v459_v22 = vpack.c.bf16 %v458_v18, %v458_v18 }
 0x390   : > { %1027 = vmatprep.subr.bf16.mxu0 %v1204_v7 }
 0x392   : > { %1018 = vmatmul.mubr.msk.bf16.vlgmr.msra.gmra.mrb[8].mxu0 %vm331_vm6, %v459_v22 }
 0x393   : > { %1028 = vmatpush3.bf16.msra.mxu0 %v596_v23  ;;  %1029 = vmatprep.mubr.msk.bf16.mxu0 %vm1205_vm4, %v1204_v7 }
 0x394   : > { %v1136_v24 = vpop.eup %1135  ;;  %1039 = vmatprep.subr.bf16.mxu0 %v1204_v7 }
 0x395   : > { %v585_v25 = vmul.f32 %v1136_v24, %v1128_v0 }
 0x397   : > { %v586_v26 = vpack.c.bf16 %v585_v25, %v585_v25 }
 0x39a   : > { %1030 = vmatmul.mubr.msk.bf16.vlgmr.msra.gmra.mrb[12].mxu0 %vm331_vm6, %v586_v26 }
 0x39b   : > { %1041 = vmatprep.mubr.msk.bf16.mxu0 %vm1205_vm4, %v1204_v7 }
 0x3b6   : > { %v710_v27 = vpop.xlane.xlu1 %709 }
 0x3b7   : > { %1137 = vrcp.f32 %v710_v27 }
 0x3ba   : > { %v718_v28 = vpop.permute.xlu1 %717 }
 0x3bb   : > { %v723_v29 = vsel %vm273_vm1, %v718_v28, 0 }
 0x3bc   : > { %1040 = vmatpush3.bf16.msra.mxu0 %v723_v29 }
 0x3c1   : > { %v1138_v30 = vpop.eup %1137 }
 0x3c2   : > { %v712_v31 = vmul.f32 %v1138_v30, %v1130_v8 }
 0x3c4   : > { %v713_v32 = vpack.c.bf16 %v712_v31, %v712_v31 }
 0x3c6   : > { %1042 = vmatmul.mubr.msk.bf16.vlgmr.msra.gmra.mrb[16].mxu0 %vm331_vm6, %v713_v32 }
 0x45c   : > { %v384_v33 = vpop.f32.mrb[4].mxu0 }
 0x45d   : > { %v390_v34 = vpack.c.bf16 %v384_v33, %v384_v33  ;;  %v1007_v35 = vpop.f32.mrb[5].mxu0 }
 0x45e   : > { %v387_v36 = vpop.f32.mrb[6].mxu0 }
 0x45f   : > { %392 = vst.msk [vmem:[#allocation3] sm:$0xf] %vm391_vm7, %v390_v34  ;;  %v1008_v37 = vpop.f32.mrb[7].mxu0 }
 0x465   : > { %v505_v39 = vpop.f32.mrb[8].mxu0 }
 0x466   : > { %v973_v41 = vpack.c.bf16 %v505_v39, %v505_v39  ;;  %v1019_v42 = vpop.f32.mrb[9].mxu0 }
 0x467   : > { %v508_v43 = vpop.f32.mrb[10].mxu0 }
 0x468   : > { %515 = vrot.lane.b32.xlu0 %v973_v41, %s1210_s27  ;;  %v1020_v44 = vpop.f32.mrb[11].mxu0 }
 0x46d   : > { %v632_v45 = vpop.f32.mrb[12].mxu0 }
 0x46e   : > { %v974_v46 = vpack.c.bf16 %v632_v45, %v632_v45  ;;  %v1031_v47 = vpop.f32.mrb[13].mxu0 }
 0x46f   : > { %v635_v48 = vpop.f32.mrb[14].mxu0 }
 0x470   : > { %642 = vrot.lane.b32.xlu1 %v974_v46, %s1208_s22  ;;  %v1032_v49 = vpop.f32.mrb[15].mxu0  ;;  %s969_s22 = sshll.u32 %s1260_s19, 7  ;;  %s860_s19 = scalar_lea.sflag [#allocation5], %s186_s12 }
 0x471   : > { %s1392_s30 = scalar_lea.hbm %s1439_s4, %s969_s22 }
 0x499   : > { %v759_v52 = vpop.f32.mrb[16].mxu0 }
 0x49a   : > { %v975_v53 = vpack.c.bf16 %v759_v52, %v759_v52  ;;  %v1043_v54 = vpop.f32.mrb[17].mxu0 }
 0x49b   : > { %v762_v55 = vpop.f32.mrb[18].mxu0 }
 0x49c   : > { %769 = vrot.lane.b32.xlu0 %v975_v53, %s1209_s23  ;;  %v1044_v56 = vpop.f32.mrb[19].mxu0  ;;  %s188_s23 = scalar_lea.vmem [#allocation4], %s936_s13 }
 0x49d   : > { %s873_s27 = sshll.u32 %s188_s23, 4  ;;  %s1394_s27 = int_to_ptr.vmem [resolvable:$true] %s873_s27 }
 0x49e   : > { %s1139_s5 = scalar_lea.vmem %s1394_s27, 128  ;;  %p1146_p0 = scmp.lt.s32.totalorder %s1394_s27, %s1144_s7 }
 0x49f   : > { %p1140_p11 = scmp.ne.s32.totalorder %s1394_s27, %s1139_s5  ;;  %p1147_p1 = scmp.lt.s32.totalorder %s1145_s8, %s1139_s5 }
 0x4a1   : > { %p1141_p12 = pnand %p1140_p11, %p1277_p5  ;;  %p1148_p2 = por %p1147_p1, %p1146_p0 }
 0x4a3   : > { %p1142_p13 = pneg %p1141_p12 }
 0x4a5   : > { %p1149_p3 = pnand %p1148_p2, %p1142_p13 }
 0x4da   : > { %v516_v57 = vpop.permute.xlu0 %515 }
 0x4db   : > { %519 = vst.msk [vmem:[#allocation3] sm:$0xf] %vm518_vm8, %v516_v57 }
 0x4e2   : > { %v643_v58 = vpop.permute.xlu1 %642 }
 0x4e3   : > { %646 = vst.msk [vmem:[#allocation3] sm:$0xf] %vm645_vm9, %v643_v58 }
 0x50e   : > { %v770_v59 = vpop.permute.xlu0 %769 }
 0x50f   : > { %773 = vst.msk [vmem:[#allocation3] sm:$0xf] %vm772_vm10, %v770_v59 }
 0x516   : > { %v774_v7 = vld [vmem:[#allocation3] sm:$0xf] }
 0x517   : > { %1054 = vmatmul.mubr.msk.bf16.vlgmr.msra.gmra.mrb[16].mxu1 %vm814_vm11, %v774_v7 }
 0x5ea   : > { %v852_v61 = vpop.f32.mrb[16].mxu1 }
 0x5eb   : > { %v853_v62 = vadd.f32 %v962_v60, %v852_v61  ;;  %v1055_v63 = vpop.f32.mrb[17].mxu1 }
 0x5ec   : > { %v855_v0 = vpop.f32.mrb[18].mxu1 }
 0x5ed   : > { %v1056_v1 = vpop.f32.mrb[19].mxu1  ;;  %858 = vst.msk [vmem:[%s188_s23] sm:$0xff] %vm220_vm0, %v853_v62 }
 0x5ee   : > { %1152 = shalt.err (!%p1149_p3)
}
 0x5ef   : > { %s1153_s9 = scalar_lea.hbm %s1392_s30, 128  ;;  %s1157_s12 = scalar_lea.hbm %s1439_s4, 256 }
 0x5f0   : > { %p1154_p4 = scmp.ne.s32.totalorder %s1392_s30, %s1153_s9  ;;  %p1158_p9 = scmp.lt.u32.totalorder %s1392_s30, %s1439_s4 }
 0x5f1   : > { %p1159_p10 = scmp.lt.u32.totalorder %s1157_s12, %s1153_s9  ;;  %p1161_p12 = scmp.lt.u32.totalorder %s1153_s9, %s1392_s30 }
 0x5f2   : > { %p1155_p7 = pnand %p1154_p4, %p1277_p5 }
 0x5f3   : > { %p1160_p11 = por %p1159_p10, %p1158_p9 }
 0x5f4   : > { %p1156_p8 = pneg %p1155_p7 }
 0x5f5   : > { %p1162_p13 = por %p1161_p12, %p1160_p11 }
 0x5f7   : > { %p1163_p0 = pnand %p1162_p13, %p1156_p8 }
 0x5f9   : > { %1166 = shalt.err (!%p1163_p0)
}
 0x5fa   : > { %1057 = dma.vmem_to_hbm [thread:$0]  (%p1277_p5), %s1394_s27, 128, %s1392_s30, %s860_s19  }
 0x5fb PF: > { %p1063_p1 = scmp.ge.s32.totalorder %s1201_s18, 2  ;;  %s885_s20 = sand.u32 1, %s1189_s15  }
 0x5fc   : > { %s886_s22 = scalar_lea.sflag [#allocation5], %s885_s20 }
 0x5fd   : > { %p1060_p2 = pnand %p1063_p1, %p1281_p6 }
 0x5ff   : > { %1184 = dma.done.wait (!%p1060_p2), %s886_s22, 128  }
 0x600   : > { %1186 = vsyncadd (!%p1060_p2), %s886_s22, 4294967168  ;;  %p14_p3 = scmp.ge.s32.totalorder %s1264_s21, 4   ;;  %s1442_s15 = smov %s1193_s16 }
 0x601   : > { %s1443_s16 = smov %s1197_s17  ;;  %s1444_s17 = smov %s1275_s24 }
 0x602   : > { %s1445_s18 = smov %s1264_s21  ;;  %16 = sbr.rel (!%p14_p3) target bundleno = 3 (0x3), region = 71 }
 0x609   :  { %891 = vsyncpa [#allocation5], 1 }
 0x60a   :  { %893 = vsyncpa [#allocation5 + $0x1], 1 }

</bundles_post_ra>
